<compile_context>
chip_gen: v7x
topology: tpu7x:2x2x1
jax: 0.10.0
libtpu: 0.0.40
codegen_flags: <defaults>
</compile_context>

<pallas_src>
import functools

import jax
import jax.numpy as jnp
from jax.experimental import pallas as pl
from jax.experimental.pallas import tpu as pltpu


def _round_up(x, m):
    return ((x + m - 1) // m) * m


def se_kernel(x_ref, w1t_ref, b1_ref, w2t_ref, b2_ref, o_ref, acc_ref, *, inv_len):
    """Grid = (n_tiles, l_tiles).  x_ref: (tile_n, C, tile_l) in native NCL layout."""
    l = pl.program_id(1)

    @pl.when(l == 0)
    def _init():
        acc_ref[...] = jnp.zeros_like(acc_ref)

    # Streaming pooled-sum: reduce over the L tile (lane axis -> XLU) with f32
    # accumulation, without materializing a converted full-block f32 copy.
    acc_ref[...] += jnp.sum(x_ref[...], axis=-1, dtype=jnp.float32)

    # Excitation MLP + sigmoid only once per N tile, at the last L step.
    @pl.when(l == pl.num_programs(1) - 1)
    def _epilogue():
        pooled = acc_ref[...] * inv_len  # mean over the true (unpadded) L
        # conv1 (1x1) == dense: (tile_n, C) @ (C, H) + (1, H), ReLU
        h = jnp.dot(pooled, w1t_ref[...], preferred_element_type=jnp.float32)
        h = jnp.maximum(h + b1_ref[...], 0.0)
        # conv2 (1x1) == dense: (tile_n, H) @ (H, C_out) + (1, C_out)
        y = jnp.dot(h, w2t_ref[...], preferred_element_type=jnp.float32) + b2_ref[...]
        # Fused logistic lowering (EUP) instead of explicit 1/(1+exp(-y)) divide.
        o_ref[...] = jax.nn.sigmoid(y).astype(o_ref.dtype)


def squeeze_excitation(x, w1, b1, w2, b2, *, tile_n=None, tile_l=None,
                       max_tile_bytes=8 * 1024 * 1024):
    """x: (N, C, L); w1: (H, C, 1); b1: (H,); w2: (C, H, 1); b2: (C,).

    Returns the SE gate of shape (N, C, 1) in x.dtype, matching the PyTorch module.
    """
    N, C, L = x.shape
    H = w1.shape[0]
    itemsize = jnp.dtype(x.dtype).itemsize

    # ---- N tiling ------------------------------------------------------------
    N8 = _round_up(N, 8)
    if tile_n is None:
        tile_n = min(128, N8)
        if N8 >= 16:
            # Keep >= 2 N tiles so the "parallel" N axis can shard across
            # TensorCores (v7x megacore).
            tile_n = min(tile_n, _round_up(N8 // 2, 8))
    else:
        tile_n = min(max(8, _round_up(tile_n, 8)), N8)
    # Keep at least a minimum-width (128-lane) block inside the byte budget.
    if tile_n * C * 128 * itemsize > max_tile_bytes:
        tile_n = max(8, (max_tile_bytes // (C * 128 * itemsize)) // 8 * 8)
    N_pad = _round_up(N, tile_n)

    # ---- L tiling (lane axis: multiple of 128, or the full L) ----------------
    budget_l = max(128, (max_tile_bytes // (tile_n * C * itemsize)) // 128 * 128)
    if tile_l is not None:
        budget_l = max(128, _round_up(tile_l, 128))
    if L <= budget_l:
        tile_l, L_pad = L, L            # single L step; full-extent lane dim
    else:
        tile_l = budget_l
        L_pad = _round_up(L, tile_l)

    pad_n, pad_l = N_pad - N, L_pad - L
    if pad_n or pad_l:
        # Zero padding: padded L contributes 0 to the sum (mean divides by the
        # true L); padded N rows are sliced off after the call.
        x = jnp.pad(x, ((0, pad_n), (0, 0), (0, pad_l)))

    # Lane-dense output slab: pad the gate's channel dim to a multiple of 128.
    C_out = _round_up(C, 128)

    # 1x1 conv weights as f32 dense-matmul operands (pre-transposed here).
    w1t = jnp.transpose(w1[:, :, 0], (1, 0)).astype(jnp.float32)  # (C, H)
    b1r = b1.reshape(1, H).astype(jnp.float32)                    # (1, H)
    w2t = jnp.transpose(w2[:, :, 0], (1, 0)).astype(jnp.float32)  # (H, C)
    b2r = b2.reshape(1, C).astype(jnp.float32)                    # (1, C)
    if C_out != C:
        w2t = jnp.pad(w2t, ((0, 0), (0, C_out - C)))
        b2r = jnp.pad(b2r, ((0, 0), (0, C_out - C)))

    grid = (N_pad // tile_n, L_pad // tile_l)
    kernel = functools.partial(se_kernel, inv_len=1.0 / float(L))

    # Explicit VMEM budget: 2x double-buffered x block + double-buffered output
    # block + weights + accumulator scratch, with headroom; capped at 48 MiB so
    # the same config is safe on v7x (64 MiB physical) as well as v5e/v6e.
    block_bytes = tile_n * C * tile_l * itemsize
    weight_bytes = (C * H + H + H * C_out + C_out) * 4
    out_block_bytes = tile_n * C_out * itemsize
    acc_bytes = tile_n * C * 4
    vmem_needed = 2 * block_bytes + 2 * out_block_bytes + 2 * weight_bytes + acc_bytes
    vmem_limit = int(min(max(vmem_needed + (2 << 20), 8 << 20), 48 << 20))

    cost = pl.CostEstimate(
        flops=4 * N * C * H,                       # two tiny (C<->H) matmuls
        transcendentals=N * C,                     # sigmoid
        bytes_accessed=N * C * L * itemsize + N * C * itemsize
                       + (C * H + H + H * C + C) * 4,
    )

    out = pl.pallas_call(
        kernel,
        out_shape=jax.ShapeDtypeStruct((N_pad, C_out), x.dtype),
        grid_spec=pltpu.PrefetchScalarGridSpec(
            num_scalar_prefetch=0,
            grid=grid,
            in_specs=[
                # Streamed activation blocks in native NCL (pipeline double-buffered).
                pl.BlockSpec((tile_n, C, tile_l), lambda n, l: (n, 0, l)),
                # Weights / biases: constant index -> loaded once, VMEM resident.
                pl.BlockSpec((C, H), lambda n, l: (0, 0)),
                pl.BlockSpec((1, H), lambda n, l: (0, 0)),
                pl.BlockSpec((H, C_out), lambda n, l: (0, 0)),
                pl.BlockSpec((1, C_out), lambda n, l: (0, 0)),
            ],
            # Output block is constant across L (accumulator-style residency).
            out_specs=pl.BlockSpec((tile_n, C_out), lambda n, l: (n, 0)),
            scratch_shapes=[pltpu.VMEM((tile_n, C), jnp.float32)],
        ),
        compiler_params=pltpu.CompilerParams(
            dimension_semantics=("parallel", "arbitrary"),
            vmem_limit_bytes=vmem_limit,
        ),
        cost_estimate=cost,
    )(x, w1t, b1r, w2t, b2r)

    # Gate in x.dtype, shaped like the PyTorch module's (N, C, 1) output.
    return out[:N, :C].reshape(N, C, 1)


def _reference(x, w1, b1, w2, b2):
    """Pure-JAX reference mirroring the PyTorch forward."""
    pooled = jnp.mean(x, axis=-1)                       # (N, C)
    h = jnp.maximum(pooled @ w1[:, :, 0].T + b1, 0.0)   # (N, H)
    y = jax.nn.sigmoid(h @ w2[:, :, 0].T + b2)          # (N, C)
    return y[:, :, None]


if __name__ == "__main__":
    # in_channels must be >= 16 so that in_channels // 16 >= 1
    N, C, L = 2, 64, 16
    H = C // 16

    key = jax.random.PRNGKey(0)
    kx, k1, k2, k3, k4 = jax.random.split(key, 5)

    x = jax.random.normal(kx, (N, C, L), dtype=jnp.float32)
    # Deterministic synthetic parameters (shapes follow nn.Conv1d(in, out, 1))
    w1 = jax.random.normal(k1, (H, C, 1), dtype=jnp.float32) * 0.1
    b1 = jax.random.normal(k2, (H,), dtype=jnp.float32) * 0.1
    w2 = jax.random.normal(k3, (C, H, 1), dtype=jnp.float32) * 0.1
    b2 = jax.random.normal(k4, (C,), dtype=jnp.float32) * 0.1

    out = squeeze_excitation(x, w1, b1, w2, b2)
    jax.block_until_ready(out)
    ref = _reference(x, w1, b1, w2, b2)
    assert out.shape == (N, C, 1), out.shape
    assert out.dtype == x.dtype, out.dtype
    assert jnp.allclose(out, ref, atol=1e-5, rtol=1e-5), "mismatch vs reference"

    # Multi-step L accumulation + ragged L / N zero-padding (L_pad=384, 3 L steps).
    N2, L2 = 3, 300
    x2 = jax.random.normal(kx, (N2, C, L2), dtype=jnp.float32)
    out2 = squeeze_excitation(x2, w1, b1, w2, b2, tile_l=128)
    jax.block_until_ready(out2)
    ref2 = _reference(x2, w1, b1, w2, b2)
    assert out2.shape == (N2, C, 1), out2.shape
    assert jnp.allclose(out2, ref2, atol=1e-5, rtol=1e-5), "mismatch vs reference (tiled)"

    # bf16 activations: f32 in-kernel accumulation, gate emitted directly in bf16.
    x3 = x2.astype(jnp.bfloat16)
    out3 = squeeze_excitation(x3, w1, b1, w2, b2, tile_l=128)
    jax.block_until_ready(out3)
    ref3 = _reference(x3.astype(jnp.float32), w1, b1, w2, b2)
    assert out3.dtype == jnp.bfloat16, out3.dtype
    assert jnp.allclose(out3.astype(jnp.float32), ref3, atol=2e-2, rtol=2e-2), \
        "mismatch vs reference (bf16)"

    print("KERNEL_OK")
</pallas_src>

<mosaic_0001>
module attributes {stable_mosaic.version = 11 : i64} {
  func.func @se_kernel(%arg0: i32, %arg1: i32, %arg2: memref<8x64x16xf32, #tpu.memory_space<vmem>>, %arg3: memref<64x4xf32, #tpu.memory_space<vmem>>, %arg4: memref<1x4xf32, #tpu.memory_space<vmem>>, %arg5: memref<4x128xf32, #tpu.memory_space<vmem>>, %arg6: memref<1x128xf32, #tpu.memory_space<vmem>>, %arg7: memref<8x128xf32, #tpu.memory_space<vmem>>, %arg8: memref<8x64xf32, #tpu.memory_space<vmem>>) attributes {dimension_semantics = [#tpu.dimension_semantics<parallel>, #tpu.dimension_semantics<arbitrary>], iteration_bounds = array<i64: 1, 1>, scalar_prefetch = 0 : i64, scratch_operands = 1 : i64, tpu.core_type = #tpu.core_type<tc>, window_params = [{transform_indices = @transform_0, window_bounds = array<i64: 8, 64, 16>}, {pipeline_mode = #tpu.pipeline_mode<synchronous>, transform_indices = @transform_1, window_bounds = array<i64: 64, 4>}, {pipeline_mode = #tpu.pipeline_mode<synchronous>, transform_indices = @transform_2, window_bounds = array<i64: 1, 4>}, {pipeline_mode = #tpu.pipeline_mode<synchronous>, transform_indices = @transform_3, window_bounds = array<i64: 4, 128>}, {pipeline_mode = #tpu.pipeline_mode<synchronous>, transform_indices = @transform_4, window_bounds = array<i64: 1, 128>}, {transform_indices = @transform_5, window_bounds = array<i64: 8, 128>}]} {
    %c0_i32 = arith.constant 0 : i32
    %0 = arith.cmpi eq, %arg1, %c0_i32 : i32
    %1 = arith.extui %0 : i1 to i32
    %c0_i32_0 = arith.constant 0 : i32
    %2 = arith.cmpi ne, %1, %c0_i32_0 : i32
    scf.if %2 {
      %cst_9 = arith.constant 0.000000e+00 : f32
      %11 = vector.broadcast %cst_9 : f32 to vector<8x64xf32>
      %c0_10 = arith.constant 0 : index
      %c0_11 = arith.constant 0 : index
      %12 = vector.load %arg8[%c0_10, %c0_11] : memref<8x64xf32, #tpu.memory_space<vmem>>, vector<8x64xf32>
      tpu.vector_store %arg8[%c0_10, %c0_11], %11 {strides = array<i32>} : memref<8x64xf32, #tpu.memory_space<vmem>>, vector<8x64xf32>,
    } else {
    }
    %c0 = arith.constant 0 : index
    %c0_1 = arith.constant 0 : index
    %3 = vector.load %arg8[%c0, %c0_1] : memref<8x64xf32, #tpu.memory_space<vmem>>, vector<8x64xf32>
    %c0_2 = arith.constant 0 : index
    %c0_3 = arith.constant 0 : index
    %c0_4 = arith.constant 0 : index
    %4 = vector.load %arg2[%c0_2, %c0_3, %c0_4] : memref<8x64x16xf32, #tpu.memory_space<vmem>>, vector<8x64x16xf32>
    %cst = arith.constant dense<0.000000e+00> : vector<8x64xf32>
    %5 = vector.multi_reduction <add>, %4, %cst [2] : vector<8x64x16xf32> to vector<8x64xf32>
    %6 = arith.addf %3, %5 : vector<8x64xf32>
    %c0_5 = arith.constant 0 : index
    %c0_6 = arith.constant 0 : index
    %7 = vector.load %arg8[%c0_5, %c0_6] : memref<8x64xf32, #tpu.memory_space<vmem>>, vector<8x64xf32>
    tpu.vector_store %arg8[%c0_5, %c0_6], %6 {strides = array<i32>} : memref<8x64xf32, #tpu.memory_space<vmem>>, vector<8x64xf32>,
    %c0_i32_7 = arith.constant 0 : i32
    %8 = arith.cmpi eq, %arg1, %c0_i32_7 : i32
    %9 = arith.extui %8 : i1 to i32
    %c0_i32_8 = arith.constant 0 : i32
    %10 = arith.cmpi ne, %9, %c0_i32_8 : i32
    scf.if %10 {
      %c0_9 = arith.constant 0 : index
      %c0_10 = arith.constant 0 : index
      %11 = vector.load %arg8[%c0_9, %c0_10] : memref<8x64xf32, #tpu.memory_space<vmem>>, vector<8x64xf32>
      %cst_11 = arith.constant 6.250000e-02 : f32
      %12 = vector.broadcast %cst_11 : f32 to vector<8x64xf32>
      %13 = arith.mulf %11, %12 : vector<8x64xf32>
      %c0_12 = arith.constant 0 : index
      %c0_13 = arith.constant 0 : index
      %14 = vector.load %arg3[%c0_12, %c0_13] : memref<64x4xf32, #tpu.memory_space<vmem>>, vector<64x4xf32>
      %cst_14 = arith.constant dense<0.000000e+00> : vector<8x4xf32>
      %15 = tpu.matmul %13, %14, %cst_14 {dimension_numbers = #tpu.dot_dimension_numbers<[1], [0], [0], [1], [0, 0, 1, 1], [], []>} : vector<8x64xf32>, vector<64x4xf32>, vector<8x4xf32> -> vector<8x4xf32>
      %c0_15 = arith.constant 0 : index
      %c0_16 = arith.constant 0 : index
      %16 = vector.load %arg4[%c0_15, %c0_16] : memref<1x4xf32, #tpu.memory_space<vmem>>, vector<1x4xf32>
      %17 = vector.broadcast %16 : vector<1x4xf32> to vector<8x4xf32>
      %18 = arith.addf %15, %17 : vector<8x4xf32>
      %cst_17 = arith.constant 0.000000e+00 : f32
      %19 = vector.broadcast %cst_17 : f32 to vector<8x4xf32>
      %20 = arith.maximumf %18, %19 : vector<8x4xf32>
      %c0_18 = arith.constant 0 : index
      %c0_19 = arith.constant 0 : index
      %21 = vector.load %arg5[%c0_18, %c0_19] : memref<4x128xf32, #tpu.memory_space<vmem>>, vector<4x128xf32>
      %cst_20 = arith.constant dense<0.000000e+00> : vector<8x128xf32>
      %22 = tpu.matmul %20, %21, %cst_20 {dimension_numbers = #tpu.dot_dimension_numbers<[1], [0], [0], [1], [0, 0, 1, 1], [], []>} : vector<8x4xf32>, vector<4x128xf32>, vector<8x128xf32> -> vector<8x128xf32>
      %c0_21 = arith.constant 0 : index
      %c0_22 = arith.constant 0 : index
      %23 = vector.load %arg6[%c0_21, %c0_22] : memref<1x128xf32, #tpu.memory_space<vmem>>, vector<1x128xf32>
      %24 = vector.broadcast %23 : vector<1x128xf32> to vector<8x128xf32>
      %25 = arith.addf %22, %24 : vector<8x128xf32>
      %26 = arith.negf %25 : vector<8x128xf32>
      %27 = math.exp %26 : vector<8x128xf32>
      %cst_23 = arith.constant 1.000000e+00 : f32
      %28 = vector.broadcast %cst_23 : f32 to vector<8x128xf32>
      %29 = arith.addf %28, %27 : vector<8x128xf32>
      %30 = arith.divf %28, %29 : vector<8x128xf32>
      %c0_24 = arith.constant 0 : index
      %c0_25 = arith.constant 0 : index
      %31 = vector.load %arg7[%c0_24, %c0_25] : memref<8x128xf32, #tpu.memory_space<vmem>>, vector<8x128xf32>
      tpu.vector_store %arg7[%c0_24, %c0_25], %30 {strides = array<i32>} : memref<8x128xf32, #tpu.memory_space<vmem>>, vector<8x128xf32>,
    } else {
    }
    return
  }
  func.func @transform_0(%arg0: i32, %arg1: i32) -> (i32, i32, i32) {
    %c0_i32 = arith.constant 0 : i32
    %c0_i32_0 = arith.constant 0 : i32
    return %arg0, %c0_i32, %arg1 : i32, i32, i32
  }
  func.func @transform_1(%arg0: i32, %arg1: i32) -> (i32, i32) {
    %c0_i32 = arith.constant 0 : i32
    %c0_i32_0 = arith.constant 0 : i32
    %c0_i32_1 = arith.constant 0 : i32
    return %c0_i32, %c0_i32_0 : i32, i32
  }
  func.func @transform_2(%arg0: i32, %arg1: i32) -> (i32, i32) {
    %c0_i32 = arith.constant 0 : i32
    %c0_i32_0 = arith.constant 0 : i32
    %c0_i32_1 = arith.constant 0 : i32
    return %c0_i32, %c0_i32_0 : i32, i32
  }
  func.func @transform_3(%arg0: i32, %arg1: i32) -> (i32, i32) {
    %c0_i32 = arith.constant 0 : i32
    %c0_i32_0 = arith.constant 0 : i32
    %c0_i32_1 = arith.constant 0 : i32
    return %c0_i32, %c0_i32_0 : i32, i32
  }
  func.func @transform_4(%arg0: i32, %arg1: i32) -> (i32, i32) {
    %c0_i32 = arith.constant 0 : i32
    %c0_i32_0 = arith.constant 0 : i32
    %c0_i32_1 = arith.constant 0 : i32
    return %c0_i32, %c0_i32_0 : i32, i32
  }
  func.func @transform_5(%arg0: i32, %arg1: i32) -> (i32, i32) {
    %c0_i32 = arith.constant 0 : i32
    %c0_i32_0 = arith.constant 0 : i32
    return %arg0, %c0_i32 : i32, i32
  }
}

</mosaic_0001>

<bundles_post_ra>
// kernel: tpu_custom_call.1
= control target key start
LH: loop header
LB: loop body
LE: loop exit
PB: predicated region body
PF: predicated region fallthrough
CT: control target
= control target key end

     0   :  { %vm92_vm0 = vcmask 130048   ;;  %s1505_s0 = inlined_call_operand.vmem [shape: f32[8,64,16], index: 0, kind: input, shape index: {}]   ;;  %s1506_s1 = inlined_call_operand.vmem [shape: f32[64,4], index: 1, kind: input, shape index: {}]   ;;  %s1507_s2 = inlined_call_operand.vmem [shape: f32[1,4], index: 2, kind: input, shape index: {}]   ;;  %s1508_s3 = inlined_call_operand.vmem [shape: f32[4,128], index: 3, kind: input, shape index: {}]   ;;  %s1509_s4 = inlined_call_operand.vmem [shape: f32[1,128], index: 4, kind: input, shape index: {}]   ;;  %s1510_s5 = inlined_call_operand.hbm [shape: f32[8,128], index: 5, kind: output, shape index: {}]  }
   0x1   :  { %v36_v0 = vld [vmem:[%s1505_s0 + $0x40] sm:$0xff]  ;;  %v37_v2 = vld [vmem:[%s1505_s0 + $0x48] sm:$0xff]  ;;  %v38_v8 = vld [vmem:[%s1505_s0 + $0x50] sm:$0xff] }
   0x2   :  { %v28_v1 = vld [vmem:[%s1505_s0] sm:$0xff]  ;;  %v117_v3 = vsel %vm92_vm0, %v36_v0, 0.0  ;;  %v29_v5 = vld [vmem:[%s1505_s0 + $0x8] sm:$0xff]  ;;  %v120_v6 = vsel %vm92_vm0, %v37_v2, 0.0  ;;  %v30_v9 = vld [vmem:[%s1505_s0 + $0x10] sm:$0xff]  ;;  %v123_v10 = vsel %vm92_vm0, %v38_v8, 0.0 }
   0x3   :  { %v93_v4 = vsel %vm92_vm0, %v28_v1, 0.0  ;;  %118 = vadd.xlane.f32.xlu1 %v117_v3  ;;  %v96_v7 = vsel %vm92_vm0, %v29_v5, 0.0  ;;  %v99_v11 = vsel %vm92_vm0, %v30_v9, 0.0  ;;  %v45_v12 = vld [vmem:[%s1505_s0 + $0x88] sm:$0xff]  ;;  %v44_v13 = vld [vmem:[%s1505_s0 + $0x80] sm:$0xff]  ;;  %v39_v16 = vld [vmem:[%s1505_s0 + $0x58] sm:$0xff] }
   0x4   :  { %94 = vadd.xlane.f32.xlu0 %v93_v4  ;;  %v144_v14 = vsel %vm92_vm0, %v45_v12, 0.0  ;;  %v141_v15 = vsel %vm92_vm0, %v44_v13, 0.0  ;;  %v31_v17 = vld [vmem:[%s1505_s0 + $0x18] sm:$0xff]  ;;  %v126_v18 = vsel %vm92_vm0, %v39_v16, 0.0  ;;  %v52_v20 = vld [vmem:[%s1505_s0 + $0xc0] sm:$0xff]  ;;  %v46_v21 = vld [vmem:[%s1505_s0 + $0x90] sm:$0xff] }
   0x5   :  { %v102_v19 = vsel %vm92_vm0, %v31_v17, 0.0  ;;  %v165_v22 = vsel %vm92_vm0, %v52_v20, 0.0  ;;  %v147_v23 = vsel %vm92_vm0, %v46_v21, 0.0  ;;  %v32_v24 = vld [vmem:[%s1505_s0 + $0x20] sm:$0xff]  ;;  %v53_v25 = vld [vmem:[%s1505_s0 + $0xc8] sm:$0xff] }
   0x7   :  { %121 = vadd.xlane.f32.xlu1 %v120_v6 }
   0x8   :  { %97 = vadd.xlane.f32.xlu0 %v96_v7 }
   0xb   :  { %124 = vadd.xlane.f32.xlu1 %v123_v10 }
   0xc   :  { %100 = vadd.xlane.f32.xlu0 %v99_v11 }
   0xf   :  { %145 = vadd.xlane.f32.xlu1 %v144_v14 }
  0x10   :  { %142 = vadd.xlane.f32.xlu0 %v141_v15 }
  0x13   :  { %127 = vadd.xlane.f32.xlu1 %v126_v18 }
  0x14   :  { %103 = vadd.xlane.f32.xlu0 %v102_v19 }
  0x17   :  { %166 = vadd.xlane.f32.xlu1 %v165_v22 }
  0x18   :  { %148 = vadd.xlane.f32.xlu0 %v147_v23 }
  0x19   :  { %10 = vsyncpa [#allocation4], 0  ;;  %v105_v26 = vsel %vm92_vm0, %v32_v24, 0.0  ;;  %v168_v27 = vsel %vm92_vm0, %v53_v25, 0.0  ;;  %v47_v28 = vld [vmem:[%s1505_s0 + $0x98] sm:$0xff]  ;;  %v40_v29 = vld [vmem:[%s1505_s0 + $0x60] sm:$0xff] }
  0x1a   :  { %v150_v30 = vsel %vm92_vm0, %v47_v28, 0.0  ;;  %v129_v31 = vsel %vm92_vm0, %v40_v29, 0.0  ;;  %v60_v32 = vld [vmem:[%s1505_s0 + $0x100] sm:$0xff]  ;;  %v54_v33 = vld [vmem:[%s1505_s0 + $0xd0] sm:$0xff]  ;;  %v33_v36 = vld [vmem:[%s1505_s0 + $0x28] sm:$0xff]  ;;  %vm25_vm1 = vcmask 523264  }
  0x1b   :  { %106 = vadd.xlane.f32.xlu1 %v105_v26  ;;  %v189_v34 = vsel %vm92_vm0, %v60_v32, 0.0  ;;  %v171_v35 = vsel %vm92_vm0, %v54_v33, 0.0  ;;  %v61_v37 = vld [vmem:[%s1505_s0 + $0x108] sm:$0xff]  ;;  %v108_v38 = vsel %vm92_vm0, %v33_v36, 0.0  ;;  %v48_v40 = vld [vmem:[%s1505_s0 + $0xa0] sm:$0xff]  ;;  %v62_v44 = vld [vmem:[%s1505_s0 + $0x110] sm:$0xff] }
  0x1c   :  { %169 = vadd.xlane.f32.xlu0 %v168_v27  ;;  %v192_v39 = vsel %vm92_vm0, %v61_v37, 0.0  ;;  %v41_v41 = vld [vmem:[%s1505_s0 + $0x68] sm:$0xff]  ;;  %v153_v42 = vsel %vm92_vm0, %v48_v40, 0.0  ;;  %v55_v45 = vld [vmem:[%s1505_s0 + $0xd8] sm:$0xff]  ;;  %v195_v46 = vsel %vm92_vm0, %v62_v44, 0.0  ;;  %v68_v49 = vld [vmem:[%s1505_s0 + $0x140] sm:$0xff] }
  0x1d   :  { %v132_v43 = vsel %vm92_vm0, %v41_v41, 0.0  ;;  %v174_v47 = vsel %vm92_vm0, %v55_v45, 0.0  ;;  %v69_v48 = vld [vmem:[%s1505_s0 + $0x148] sm:$0xff]  ;;  %v213_v51 = vsel %vm92_vm0, %v68_v49, 0.0  ;;  %v42_v52 = vld [vmem:[%s1505_s0 + $0x70] sm:$0xff]  ;;  %v56_v56 = vld [vmem:[%s1505_s0 + $0xe0] sm:$0xff] }
  0x1e   :  { %v216_v50 = vsel %vm92_vm0, %v69_v48, 0.0  ;;  %v34_v53 = vld [vmem:[%s1505_s0 + $0x30] sm:$0xff]  ;;  %v135_v54 = vsel %vm92_vm0, %v42_v52, 0.0  ;;  %v49_v57 = vld [vmem:[%s1505_s0 + $0xa8] sm:$0xff]  ;;  %v177_v58 = vsel %vm92_vm0, %v56_v56, 0.0  ;;  %v63_v61 = vld [vmem:[%s1505_s0 + $0x118] sm:$0xff] }
  0x1f   :  { %151 = vadd.xlane.f32.xlu1 %v150_v30  ;;  %v111_v55 = vsel %vm92_vm0, %v34_v53, 0.0  ;;  %v156_v59 = vsel %vm92_vm0, %v49_v57, 0.0  ;;  %v70_v60 = vld [vmem:[%s1505_s0 + $0x150] sm:$0xff]  ;;  %v198_v63 = vsel %vm92_vm0, %v63_v61, 0.0  ;;  %v77_v0 = vld [vmem:[%s1505_s0 + $0x188] sm:$0xff]  ;;  %v76_v1 = vld [vmem:[%s1505_s0 + $0x180] sm:$0xff] }
  0x20   :  { %130 = vadd.xlane.f32.xlu0 %v129_v31  ;;  %v219_v62 = vsel %vm92_vm0, %v70_v60, 0.0  ;;  %v240_v2 = vsel %vm92_vm0, %v77_v0, 0.0  ;;  %v237_v3 = vsel %vm92_vm0, %v76_v1, 0.0  ;;  %v43_v4 = vld [vmem:[%s1505_s0 + $0x78] sm:$0xff]  ;;  %v57_v8 = vld [vmem:[%s1505_s0 + $0xe8] sm:$0xff]  ;;  %v50_v9 = vld [vmem:[%s1505_s0 + $0xb0] sm:$0xff]  ;;  %v349_v0 = vlaneseq }
  0x21   :  { %v35_v5 = vld [vmem:[%s1505_s0 + $0x38] sm:$0xff]  ;;  %v138_v6 = vsel %vm92_vm0, %v43_v4, 0.0  ;;  %v180_v10 = vsel %vm92_vm0, %v57_v8, 0.0  ;;  %v159_v11 = vsel %vm92_vm0, %v50_v9, 0.0  ;;  %v64_v13 = vld [vmem:[%s1505_s0 + $0x120] sm:$0xff]  ;;  %v78_v17 = vld [vmem:[%s1505_s0 + $0x190] sm:$0xff] }
  0x22   :  { %v114_v7 = vsel %vm92_vm0, %v35_v5, 0.0  ;;  %v71_v12 = vld [vmem:[%s1505_s0 + $0x158] sm:$0xff]  ;;  %v201_v15 = vsel %vm92_vm0, %v64_v13, 0.0  ;;  %v84_v16 = vld [vmem:[%s1505_s0 + $0x1c0] sm:$0xff]  ;;  %v243_v19 = vsel %vm92_vm0, %v78_v17, 0.0  ;;  %v85_v21 = vld [vmem:[%s1505_s0 + $0x1c8] sm:$0xff] }
  0x23   :  { %190 = vadd.xlane.f32.xlu1 %v189_v34  ;;  %v222_v14 = vsel %vm92_vm0, %v71_v12, 0.0  ;;  %v261_v18 = vsel %vm92_vm0, %v84_v16, 0.0  ;;  %v51_v20 = vld [vmem:[%s1505_s0 + $0xb8] sm:$0xff]  ;;  %v264_v23 = vsel %vm92_vm0, %v85_v21, 0.0  ;;  %v65_v24 = vld [vmem:[%s1505_s0 + $0x128] sm:$0xff]  ;;  %v58_v25 = vld [vmem:[%s1505_s0 + $0xf0] sm:$0xff] }
  0x24   :  { %172 = vadd.xlane.f32.xlu0 %v171_v35  ;;  %v162_v22 = vsel %vm92_vm0, %v51_v20, 0.0  ;;  %v204_v26 = vsel %vm92_vm0, %v65_v24, 0.0  ;;  %v183_v27 = vsel %vm92_vm0, %v58_v25, 0.0  ;;  %v79_v28 = vld [vmem:[%s1505_s0 + $0x198] sm:$0xff]  ;;  %v72_v29 = vld [vmem:[%s1505_s0 + $0x160] sm:$0xff]  ;;  %v86_v33 = vld [vmem:[%s1505_s0 + $0x1d0] sm:$0xff] }
  0x25   :  { %v246_v30 = vsel %vm92_vm0, %v79_v28, 0.0  ;;  %v225_v31 = vsel %vm92_vm0, %v72_v29, 0.0  ;;  %v59_v32 = vld [vmem:[%s1505_s0 + $0xf8] sm:$0xff]  ;;  %v267_v35 = vsel %vm92_vm0, %v86_v33, 0.0  ;;  %v73_v36 = vld [vmem:[%s1505_s0 + $0x168] sm:$0xff]  ;;  %v66_v37 = vld [vmem:[%s1505_s0 + $0x130] sm:$0xff] }
  0x26   :  { %v186_v34 = vsel %vm92_vm0, %v59_v32, 0.0  ;;  %v87_v40 = vld [vmem:[%s1505_s0 + $0x1d8] sm:$0xff]  ;;  %v80_v41 = vld [vmem:[%s1505_s0 + $0x1a0] sm:$0xff]  ;;  %v74_v44 = vld [vmem:[%s1505_s0 + $0x170] sm:$0xff]  ;;  %v981_v1 = vmov 0.0   ;;  %v1280_v5 = vshrl.u32 %v349_v0, 7 }
  0x27   :  { %109 = vadd.xlane.f32.xlu1 %v108_v38  ;;  %v228_v38 = vsel %vm92_vm0, %v73_v36, 0.0  ;;  %v67_v45 = vld [vmem:[%s1505_s0 + $0x138] sm:$0xff]  ;;  %v88_v48 = vld [vmem:[%s1505_s0 + $0x1e0] sm:$0xff]  ;;  %v81_v49 = vld [vmem:[%s1505_s0 + $0x1a8] sm:$0xff]  ;;  %26 = vst.msk [vmem:[#allocation2] sm:$0xff] %vm25_vm1, %v981_v1  ;;  %932 = vmatprep.subr.mxu1 %v981_v1  ;;  %v982_v8 = vmov 0.0|0.0  }
  0x28   :  { %193 = vadd.xlane.f32.xlu0 %v192_v39  ;;  %v207_v39 = vsel %vm92_vm0, %v66_v37, 0.0  ;;  %v82_v52 = vld [vmem:[%s1505_s0 + $0x1b0] sm:$0xff]  ;;  %v75_v53 = vld [vmem:[%s1505_s0 + $0x178] sm:$0xff]  ;;  %v89_v57 = vld [vmem:[%s1505_s0 + $0x1e8] sm:$0xff]  ;;  %937 = vmatprep.subr.bf16.mxu0 %v982_v8  ;;  %vm983_vm2 = vmmov 0   ;;  %vm360_vm3 = vcmask 130112  }
  0x29   :  { %v83_v56 = vld [vmem:[%s1505_s0 + $0x1b8] sm:$0xff]  ;;  %v90_v60 = vld [vmem:[%s1505_s0 + $0x1f0] sm:$0xff]  ;;  %v701_v4 = vld [vmem:[%s1506_s1 + $0x8] sm:$0xff]  ;;  %929 = vmatprep.mubr.msk.f32.mxu0 %vm983_vm2, %v981_v1  ;;  %934 = vmatprep.mubr.msk.f32.mxu1 %vm983_vm2, %v981_v1  ;;  %vm367_vm4 = vcmask 195712   ;;  %vm374_vm5 = vcmask 261312   ;;  %vm381_vm6 = vcmask 326912  }
  0x2a   :  { %v91_v61 = vld [vmem:[%s1505_s0 + $0x1f8] sm:$0xff]  ;;  %v702_v12 = vld [vmem:[%s1506_s1 + $0x10] sm:$0xff]  ;;  %v704_v17 = vld [vmem:[%s1506_s1 + $0x20] sm:$0xff]  ;;  %vm388_vm7 = vcmask 392512   ;;  %vm395_vm8 = vcmask 458112   ;;  %vm402_vm9 = vcmask 523712  }
  0x2b   :  { %154 = vadd.xlane.f32.xlu1 %v153_v42  ;;  %v270_v42 = vsel %vm92_vm0, %v87_v40, 0.0  ;;  %v703_v13 = vld [vmem:[%s1506_s1 + $0x18] sm:$0xff]  ;;  %vm677_vm10 = vcmask 1041409   ;;  %vm679_vm11 = vcmask 1042434   ;;  %vm681_vm12 = vcmask 1043459  }
  0x2c   :  { %133 = vadd.xlane.f32.xlu0 %v132_v43  ;;  %v249_v43 = vsel %vm92_vm0, %v80_v41, 0.0  ;;  %v941_v16 = vpack.c.bf16 %v703_v13, %v702_v12  ;;  %v707_v24 = vld [vmem:[%s1506_s1 + $0x38] sm:$0xff]  ;;  %vm683_vm13 = vcmask 1044484   ;;  %vm685_vm14 = vcmask 1045509  }
  0x2d   :  { %vm687_vm15 = vcmask 1046534   ;;  %vm801_vm2 = vcmask 1043456  }
  0x2f   :  { %196 = vadd.xlane.f32.xlu1 %v195_v46  ;;  %v231_v46 = vsel %vm92_vm0, %v74_v44, 0.0 }
  0x30   :  { %175 = vadd.xlane.f32.xlu0 %v174_v47  ;;  %v210_v47 = vsel %vm92_vm0, %v67_v45, 0.0 }
  0x33   :  { %217 = vadd.xlane.f32.xlu1 %v216_v50  ;;  %v273_v50 = vsel %vm92_vm0, %v88_v48, 0.0 }
  0x34   :  { %214 = vadd.xlane.f32.xlu0 %v213_v51  ;;  %v252_v51 = vsel %vm92_vm0, %v81_v49, 0.0 }
  0x37   :  { %136 = vadd.xlane.f32.xlu1 %v135_v54  ;;  %v255_v54 = vsel %vm92_vm0, %v82_v52, 0.0 }
  0x38   :  { %112 = vadd.xlane.f32.xlu0 %v111_v55  ;;  %v234_v55 = vsel %vm92_vm0, %v75_v53, 0.0 }
  0x3b   :  { %178 = vadd.xlane.f32.xlu1 %v177_v58  ;;  %v258_v58 = vsel %vm92_vm0, %v83_v56, 0.0 }
  0x3c   :  { %157 = vadd.xlane.f32.xlu0 %v156_v59  ;;  %v276_v59 = vsel %vm92_vm0, %v89_v57, 0.0 }
  0x3f   :  { %220 = vadd.xlane.f32.xlu1 %v219_v62  ;;  %v279_v62 = vsel %vm92_vm0, %v90_v60, 0.0 }
  0x40   :  { %199 = vadd.xlane.f32.xlu0 %v198_v63  ;;  %v282_v63 = vsel %vm92_vm0, %v91_v61, 0.0  ;;  %vm689_vm0 = vcmask 1047559  }
  0x43   :  { %241 = vadd.xlane.f32.xlu1 %v240_v2  ;;  %v1272_v2 = vand.u32 127, %v349_v0 }
  0x44   :  { %238 = vadd.xlane.f32.xlu0 %v237_v3  ;;  %v700_v3 = vld [vmem:[%s1506_s1] sm:$0xff] }
  0x45   :  { %v369_v36 = vadd.s32 4294967272, %v1272_v2  ;;  %v376_v49 = vadd.s32 4294967264, %v1272_v2 }
  0x47   :  { %139 = vadd.xlane.f32.xlu1 %v138_v6  ;;  %v355_v6 = vadd.s32 4294967288, %v1272_v2 }
  0x48   :  { %115 = vadd.xlane.f32.xlu0 %v114_v7  ;;  %v938_v7 = vpack.c.bf16 %v701_v4, %v700_v3 }
  0x4a   :  { %939 = vmatpush3.bf16.msra.mxu0 %v938_v7 }
  0x4b   :  { %181 = vadd.xlane.f32.xlu1 %v180_v10  ;;  %940 = vmatprep.subr.bf16.mxu0 %v982_v8 }
  0x4c   :  { %160 = vadd.xlane.f32.xlu0 %v159_v11  ;;  %v362_v11 = vadd.s32 4294967280, %v1272_v2 }
  0x4e   :  { %942 = vmatpush3.bf16.msra.mxu0 %v941_v16 }
  0x4f   :  { %223 = vadd.xlane.f32.xlu1 %v222_v14  ;;  %v1292_v14 = vsub.s32 %v1272_v2, %v1280_v5  ;;  %943 = vmatprep.subr.bf16.mxu0 %v982_v8 }
  0x50   :  { %202 = vadd.xlane.f32.xlu0 %v201_v15  ;;  %v1295_v15 = vsub.s32 %v355_v6, %v1280_v5  ;;  %v383_v6 = vadd.s32 4294967256, %v1272_v2 }
  0x52   :  { %v1351_v12 = vsub.s32 %v383_v6, %v1280_v5 }
  0x53   :  { %262 = vadd.xlane.f32.xlu1 %v261_v18  ;;  %v705_v18 = vld [vmem:[%s1506_s1 + $0x28] sm:$0xff] }
  0x54   :  { %244 = vadd.xlane.f32.xlu0 %v243_v19  ;;  %v944_v19 = vpack.c.bf16 %v705_v18, %v704_v17 }
  0x56   :  { %945 = vmatpush3.bf16.msra.mxu0 %v944_v19 }
  0x57   :  { %163 = vadd.xlane.f32.xlu1 %v162_v22  ;;  %v1304_v22 = vsub.s32 %v362_v11, %v1280_v5  ;;  %946 = vmatprep.subr.bf16.mxu0 %v982_v8 }
  0x58   :  { %265 = vadd.xlane.f32.xlu0 %v264_v23  ;;  %v706_v23 = vld [vmem:[%s1506_s1 + $0x30] sm:$0xff] }
  0x5b   :  { %205 = vadd.xlane.f32.xlu1 %v204_v26 }
  0x5c   :  { %184 = vadd.xlane.f32.xlu0 %v183_v27 }
  0x5f   :  { %247 = vadd.xlane.f32.xlu1 %v246_v30 }
  0x60   :  { %226 = vadd.xlane.f32.xlu0 %v225_v31  ;;  %v947_v31 = vpack.c.bf16 %v707_v24, %v706_v23 }
  0x62   :  { %948 = vmatpush3.bf16.msra.mxu0 %v947_v31 }
  0x63   :  { %187 = vadd.xlane.f32.xlu1 %v186_v34 }
  0x64   :  { %268 = vadd.xlane.f32.xlu0 %v267_v35 }
  0x67   :  { %229 = vadd.xlane.f32.xlu1 %v228_v38 }
  0x68   :  { %208 = vadd.xlane.f32.xlu0 %v207_v39 }
  0x6b   :  { %271 = vadd.xlane.f32.xlu1 %v270_v42 }
  0x6c   :  { %250 = vadd.xlane.f32.xlu0 %v249_v43  ;;  %v1326_v43 = vsub.s32 %v369_v36, %v1280_v5 }
  0x6f   :  { %232 = vadd.xlane.f32.xlu1 %v231_v46 }
  0x70   :  { %211 = vadd.xlane.f32.xlu0 %v210_v47 }
  0x73   :  { %274 = vadd.xlane.f32.xlu1 %v273_v50 }
  0x74   :  { %253 = vadd.xlane.f32.xlu0 %v252_v51 }
  0x77   :  { %256 = vadd.xlane.f32.xlu1 %v255_v54 }
  0x78   :  { %235 = vadd.xlane.f32.xlu0 %v234_v55  ;;  %v1336_v55 = vsub.s32 %v376_v49, %v1280_v5 }
  0x7b   :  { %259 = vadd.xlane.f32.xlu1 %v258_v58 }
  0x7c   :  { %277 = vadd.xlane.f32.xlu0 %v276_v59 }
  0x7f   :  { %283 = vadd.xlane.f32.xlu1 %v282_v63 }
  0x80   :  { %280 = vadd.xlane.f32.xlu0 %v279_v62 }
  0x90   :  { %v119_v9 = vpop.xlane.xlu1 %118 }
  0x91   :  { %v95_v10 = vpop.xlane.xlu0 %94  ;;  %v407_v25 = vrot.slane %v119_v9, %v1292_v14 }
  0x92   :  { %v354_v26 = vrot.slane %v95_v10, %v1292_v14 }
  0x94   :  { %v122_v20 = vpop.xlane.xlu1 %121 }
  0x95   :  { %v98_v21 = vpop.xlane.xlu0 %97  ;;  %v411_v27 = vrot.slane %v122_v20, %v1295_v15 }
  0x96   :  { %v359_v28 = vrot.slane %v98_v21, %v1295_v15 }
  0x97   :  { %v412_v29 = vsel %vm360_vm3, %v411_v27, %v407_v25 }
  0x98   :  { %v361_v30 = vsel %vm360_vm3, %v359_v28, %v354_v26  ;;  %v125_v32 = vpop.xlane.xlu1 %124 }
  0x99   :  { %v101_v33 = vpop.xlane.xlu0 %100  ;;  %v416_v34 = vrot.slane %v125_v32, %v1304_v22 }
  0x9a   :  { %v366_v35 = vrot.slane %v101_v33, %v1304_v22 }
  0x9b   :  { %v417_v37 = vsel %vm367_vm4, %v416_v34, %v412_v29  ;;  %v390_v34 = vadd.s32 4294967248, %v1272_v2 }
  0x9c   :  { %v368_v38 = vsel %vm367_vm4, %v366_v35, %v361_v30  ;;  %v146_v39 = vpop.xlane.xlu1 %145 }
  0x9d   :  { %v143_v40 = vpop.xlane.xlu0 %142  ;;  %v450_v41 = vrot.slane %v146_v39, %v1295_v15 }
  0x9e   :  { %v446_v42 = vrot.slane %v143_v40, %v1292_v14 }
  0xa0   :  { %v451_v44 = vsel %vm360_vm3, %v450_v41, %v446_v42  ;;  %v128_v45 = vpop.xlane.xlu1 %127  ;;  %v1373_v41 = vsub.s32 %v390_v34, %v1280_v5 }
  0xa1   :  { %v104_v46 = vpop.xlane.xlu0 %103  ;;  %v421_v47 = vrot.slane %v128_v45, %v1326_v43 }
  0xa2   :  { %v373_v48 = vrot.slane %v104_v46, %v1326_v43 }
  0xa3   :  { %v422_v50 = vsel %vm374_vm5, %v421_v47, %v417_v37 }
  0xa4   :  { %v375_v51 = vsel %vm374_vm5, %v373_v48, %v368_v38  ;;  %v167_v52 = vpop.xlane.xlu1 %166 }
  0xa5   :  { %v149_v53 = vpop.xlane.xlu0 %148  ;;  %v485_v59 = vrot.slane %v167_v52, %v1292_v14 }
  0xa6   :  { %v455_v54 = vrot.slane %v149_v53, %v1304_v22 }
  0xa8   :  { %v456_v56 = vsel %vm367_vm4, %v455_v54, %v451_v44  ;;  %v107_v57 = vpop.xlane.xlu1 %106  ;;  %v397_v54 = vadd.s32 4294967240, %v1272_v2 }
  0xa9   :  { %v170_v58 = vpop.xlane.xlu0 %169  ;;  %v380_v60 = vrot.slane %v107_v57, %v1336_v55 }
  0xaa   :  { %v489_v61 = vrot.slane %v170_v58, %v1295_v15  ;;  %v1390_v58 = vsub.s32 %v397_v54, %v1280_v5 }
  0xab   :  { %v382_v62 = vsel %vm381_vm6, %v380_v60, %v375_v51 }
  0xac   :  { %v490_v63 = vsel %vm360_vm3, %v489_v61, %v485_v59  ;;  %v152_v0 = vpop.xlane.xlu1 %151 }
  0xad   :  { %v131_v1 = vpop.xlane.xlu0 %130  ;;  %v460_v3 = vrot.slane %v152_v0, %v1326_v43 }
  0xae   :  { %v426_v4 = vrot.slane %v131_v1, %v1336_v55 }
  0xaf   :  { %v461_v7 = vsel %vm374_vm5, %v460_v3, %v456_v56 }
  0xb0   :  { %v427_v8 = vsel %vm381_vm6, %v426_v4, %v422_v50  ;;  %v191_v9 = vpop.xlane.xlu1 %190 }
  0xb1   :  { %v173_v10 = vpop.xlane.xlu0 %172  ;;  %v524_v18 = vrot.slane %v191_v9, %v1292_v14 }
  0xb2   :  { %v494_v11 = vrot.slane %v173_v10, %v1304_v22 }
  0xb4   :  { %v495_v13 = vsel %vm367_vm4, %v494_v11, %v490_v63  ;;  %v110_v16 = vpop.xlane.xlu1 %109 }
  0xb5   :  { %v194_v17 = vpop.xlane.xlu0 %193  ;;  %v387_v19 = vrot.slane %v110_v16, %v1351_v12 }
  0xb6   :  { %v528_v20 = vrot.slane %v194_v17, %v1295_v15 }
  0xb7   :  { %v389_v21 = vsel %vm388_vm7, %v387_v19, %v382_v62 }
  0xb8   :  { %v529_v23 = vsel %vm360_vm3, %v528_v20, %v524_v18  ;;  %v155_v24 = vpop.xlane.xlu1 %154 }
  0xb9   :  { %v134_v25 = vpop.xlane.xlu0 %133  ;;  %v465_v26 = vrot.slane %v155_v24, %v1336_v55 }
  0xba   :  { %v431_v27 = vrot.slane %v134_v25, %v1351_v12 }
  0xbb   :  { %v466_v28 = vsel %vm381_vm6, %v465_v26, %v461_v7 }
  0xbc   :  { %v432_v29 = vsel %vm388_vm7, %v431_v27, %v427_v8  ;;  %v197_v30 = vpop.xlane.xlu1 %196 }
  0xbd   :  { %v176_v31 = vpop.xlane.xlu0 %175  ;;  %v533_v32 = vrot.slane %v197_v30, %v1304_v22 }
  0xbe   :  { %v499_v33 = vrot.slane %v176_v31, %v1326_v43 }
  0xbf   :  { %v1367_v35 = vsel %vm367_vm4, %v533_v32, %v529_v23 }
  0xc0   :  { %v500_v36 = vsel %vm374_vm5, %v499_v33, %v495_v13  ;;  %v218_v37 = vpop.xlane.xlu1 %217 }
  0xc1   :  { %v215_v38 = vpop.xlane.xlu0 %214  ;;  %v567_v39 = vrot.slane %v218_v37, %v1295_v15 }
  0xc2   :  { %v563_v40 = vrot.slane %v215_v38, %v1292_v14 }
  0xc4   :  { %v1376_v42 = vsel %vm360_vm3, %v567_v39, %v563_v40  ;;  %v137_v44 = vpop.xlane.xlu1 %136 }
  0xc5   :  { %v113_v45 = vpop.xlane.xlu0 %112  ;;  %v436_v46 = vrot.slane %v137_v44, %v1373_v41 }
  0xc6   :  { %v394_v47 = vrot.slane %v113_v45, %v1373_v41 }
  0xc7   :  { %v437_v48 = vsel %vm395_vm8, %v436_v46, %v432_v29 }
  0xc8   :  { %v396_v49 = vsel %vm395_vm8, %v394_v47, %v389_v21  ;;  %v179_v50 = vpop.xlane.xlu1 %178 }
  0xc9   :  { %v158_v51 = vpop.xlane.xlu0 %157  ;;  %v504_v23 = vrot.slane %v179_v50, %v1336_v55 }
  0xca   :  { %v470_v8 = vrot.slane %v158_v51, %v1351_v12 }
  0xcc   :  { %v1382_v52 = vpop.xlane.xlu1 %220  ;;  %v471_v13 = vsel %vm388_vm7, %v470_v8, %v466_v28  ;;  %v505_v28 = vsel %vm381_vm6, %v504_v23, %v500_v36 }
  0xcd   :  { %v200_v53 = vpop.xlane.xlu0 %199 }
  0xce   :  { %v538_v40 = vrot.slane %v200_v53, %v1326_v43 }
  0xd0   :  { %v1385_v56 = vpop.xlane.xlu1 %241 }
  0xd1   :  { %v1387_v57 = vpop.xlane.xlu0 %238 }
  0xd4   :  { %v140_v59 = vpop.xlane.xlu1 %139 }
  0xd5   :  { %v116_v60 = vpop.xlane.xlu0 %115  ;;  %v441_v61 = vrot.slane %v140_v59, %v1390_v58  ;;  %v572_v59 = vrot.slane %v1382_v52, %v1304_v22  ;;  %v602_v52 = vrot.slane %v1387_v57, %v1292_v14 }
  0xd6   :  { %v401_v62 = vrot.slane %v116_v60, %v1390_v58 }
  0xd7   :  { %v442_v63 = vsel %vm402_vm9, %v441_v61, %v437_v48  ;;  %v539_v48 = vsel %vm374_vm5, %v538_v40, %v1367_v35 }
  0xd8   :  { %v403_v0 = vsel %vm402_vm9, %v401_v62, %v396_v49  ;;  %v182_v1 = vpop.xlane.xlu1 %181 }
  0xd9   :  { %v678_v2 = vsel %vm677_vm10, %v442_v63, %v403_v0  ;;  %v161_v3 = vpop.xlane.xlu0 %160  ;;  %v509_v26 = vrot.slane %v182_v1, %v1351_v12 }
  0xda   :  { %v475_v9 = vrot.slane %v161_v3, %v1373_v41  ;;  %v573_v3 = vsel %vm367_vm4, %v572_v59, %v1376_v42 }
  0xdb   :  { %v510_v31 = vsel %vm388_vm7, %v509_v26, %v505_v28 }
  0xdc   :  { %v224_v4 = vpop.xlane.xlu1 %223  ;;  %v476_v17 = vsel %vm395_vm8, %v475_v9, %v471_v13 }
  0xdd   :  { %v203_v6 = vpop.xlane.xlu0 %202  ;;  %v577_v61 = vrot.slane %v224_v4, %v1326_v43 }
  0xde   :  { %v543_v44 = vrot.slane %v203_v6, %v1336_v55  ;;  %v606_v6 = vrot.slane %v1385_v56, %v1295_v15 }
  0xdf   :  { %v578_v8 = vsel %vm374_vm5, %v577_v61, %v573_v3  ;;  %v898_v61 = vld [vmem:[%s1509_s4] ss:$0 sm:$0xff] }
  0xe0   :  { %v1396_v7 = vpop.xlane.xlu1 %262  ;;  %v544_v49 = vsel %vm381_vm6, %v543_v44, %v539_v48  ;;  %v607_v57 = vsel %vm360_vm3, %v606_v6, %v602_v52 }
  0xe1   :  { %v1398_v5 = vpop.xlane.xlu0 %244 }
  0xe2   :  { %v611_v9 = vrot.slane %v1398_v5, %v1304_v22 }
  0xe4   :  { %v164_v10 = vpop.xlane.xlu1 %163 }
  0xe5   :  { %v1402_v11 = vpop.xlane.xlu0 %265  ;;  %v480_v16 = vrot.slane %v164_v10, %v1390_v58 }
  0xe7   :  { %v481_v18 = vsel %vm402_vm9, %v480_v16, %v476_v17 }
  0xe8   :  { %v680_v19 = vsel %vm679_vm11, %v481_v18, %v678_v2  ;;  %v206_v20 = vpop.xlane.xlu1 %205  ;;  %v645_v18 = vrot.slane %v1402_v11, %v1295_v15 }
  0xe9   :  { %v185_v21 = vpop.xlane.xlu0 %184  ;;  %v548_v46 = vrot.slane %v206_v20, %v1351_v12  ;;  %v641_v20 = vrot.slane %v1396_v7, %v1292_v14 }
  0xea   :  { %v514_v27 = vrot.slane %v185_v21, %v1373_v41 }
  0xeb   :  { %v549_v54 = vsel %vm388_vm7, %v548_v46, %v544_v49 }
  0xec   :  { %v1409_v24 = vpop.xlane.xlu1 %247  ;;  %v515_v33 = vsel %vm395_vm8, %v514_v27, %v510_v31 }
  0xed   :  { %v227_v25 = vpop.xlane.xlu0 %226  ;;  %v616_v42 = vrot.slane %v1409_v24, %v1326_v43 }
  0xee   :  { %v582_v35 = vrot.slane %v227_v25, %v1336_v55  ;;  %v612_v25 = vsel %vm367_vm4, %v611_v9, %v607_v57 }
  0xf0   :  { %v188_v29 = vpop.xlane.xlu1 %187  ;;  %v583_v10 = vsel %vm381_vm6, %v582_v35, %v578_v8 }
  0xf1   :  { %v1414_v30 = vpop.xlane.xlu0 %268  ;;  %v519_v32 = vrot.slane %v188_v29, %v1390_v58  ;;  %v617_v29 = vsel %vm374_vm5, %v616_v42, %v612_v25 }
  0xf2   :  { %v650_v21 = vrot.slane %v1414_v30, %v1304_v22  ;;  %v646_v22 = vsel %vm360_vm3, %v645_v18, %v641_v20  ;;  %vm797_vm3 = vcmask 31744  }
  0xf3   :  { %v520_v34 = vsel %vm402_vm9, %v519_v32, %v515_v33 }
  0xf4   :  { %v682_v37 = vsel %vm681_vm12, %v520_v34, %v680_v19  ;;  %v230_v38 = vpop.xlane.xlu1 %229  ;;  %v651_v32 = vsel %vm367_vm4, %v650_v21, %v646_v22 }
  0xf5   :  { %v209_v39 = vpop.xlane.xlu0 %208  ;;  %v587_v1 = vrot.slane %v230_v38, %v1351_v12 }
  0xf6   :  { %v553_v47 = vrot.slane %v209_v39, %v1373_v41 }
  0xf7   :  { %v588_v17 = vsel %vm388_vm7, %v587_v1, %v583_v10 }
  0xf8   :  { %v272_v36 = vpop.xlane.xlu1 %271  ;;  %v554_v60 = vsel %vm395_vm8, %v553_v47, %v549_v54 }
  0xf9   :  { %v251_v45 = vpop.xlane.xlu0 %250  ;;  %v655_v26 = vrot.slane %v272_v36, %v1326_v43 }
  0xfa   :  { %v621_v19 = vrot.slane %v251_v45, %v1336_v55  ;;  %v27_v45 = vld [vmem:[#allocation2] sm:$0xff] }
  0xfb   :  { %v656_v33 = vsel %vm374_vm5, %v655_v26, %v651_v32 }
  0xfc   :  { %v233_v50 = vpop.xlane.xlu1 %232  ;;  %v622_v30 = vsel %vm381_vm6, %v621_v19, %v617_v29 }
  0xfd   :  { %v212_v51 = vpop.xlane.xlu0 %211  ;;  %v592_v4 = vrot.slane %v233_v50, %v1373_v41 }
  0xfe   :  { %v558_v53 = vrot.slane %v212_v51, %v1390_v58 }
  0xff   :  { %v593_v5 = vsel %vm395_vm8, %v592_v4, %v588_v17 }
 0x100   :  { %v559_v62 = vsel %vm402_vm9, %v558_v53, %v554_v60  ;;  %v275_v0 = vpop.xlane.xlu1 %274 }
 0x101   :  { %v684_v63 = vsel %vm683_vm13, %v559_v62, %v682_v37  ;;  %v254_v2 = vpop.xlane.xlu0 %253  ;;  %v660_v14 = vrot.slane %v275_v0, %v1336_v55 }
 0x102   :  { %v626_v23 = vrot.slane %v254_v2, %v1351_v12 }
 0x103   :  { %v661_v55 = vsel %vm381_vm6, %v660_v14, %v656_v33 }
 0x104   :  { %v257_v13 = vpop.xlane.xlu1 %256  ;;  %v627_v43 = vsel %vm388_vm7, %v626_v23, %v622_v30 }
 0x105   :  { %v236_v16 = vpop.xlane.xlu0 %235  ;;  %v631_v15 = vrot.slane %v257_v13, %v1373_v41 }
 0x106   :  { %v597_v56 = vrot.slane %v236_v16, %v1390_v58 }
 0x107   :  { %v632_v34 = vsel %vm395_vm8, %v631_v15, %v627_v43 }
 0x108   :  { %v598_v24 = vsel %vm402_vm9, %v597_v56, %v593_v5  ;;  %v260_v27 = vpop.xlane.xlu1 %259 }
 0x109   :  { %v686_v11 = vsel %vm685_vm14, %v598_v24, %v684_v63  ;;  %v278_v28 = vpop.xlane.xlu0 %277  ;;  %v636_v7 = vrot.slane %v260_v27, %v1390_v58 }
 0x10a   :  { %v665_v31 = vrot.slane %v278_v28, %v1351_v12 }
 0x10b   :  { %v637_v39 = vsel %vm402_vm9, %v636_v7, %v632_v34 }
 0x10c   :  { %v284_v38 = vpop.xlane.xlu1 %283  ;;  %v666_v12 = vsel %vm388_vm7, %v665_v31, %v661_v55  ;;  %v688_v46 = vsel %vm687_vm15, %v637_v39, %v686_v11 }
 0x10d   :  { %v281_v37 = vpop.xlane.xlu0 %280  ;;  %v675_v44 = vrot.slane %v284_v38, %v1390_v58  ;;  %v896_v58 = vld [vmem:[%s1507_s2] ss:$0 sm:$0xff] }
 0x10e   :  { %v670_v40 = vrot.slane %v281_v37, %v1373_v41  ;;  %v789_v41 = vld [vmem:[%s1508_s3] sm:$0xf]  ;;  %s984_s3 = smov [#allocation3]  }
 0x10f   :  { %933 = vmatpush3.msk.msra.mxu1 %vm801_vm2, %v789_v41  ;;  %s888_s2 = sshll.u32 %s984_s3, 4  ;;  %s889_s2 = int_to_ptr.vmem [resolvable:$true] %s888_s2 }
 0x110   :  { %v671_v36 = vsel %vm395_vm8, %v670_v40, %v666_v12  ;;  %s957_s16 = scalar_lea.vmem %s889_s2, 128  ;;  %p962_p1 = scmp.lt.s32.totalorder %s889_s2, %s889_s2 }
 0x111   :  { %v676_v47 = vsel %vm402_vm9, %v675_v44, %v671_v36  ;;  %p958_p0 = scmp.ne.s32.totalorder %s889_s2, %s957_s16  ;;  %p963_p2 = scmp.lt.s32.totalorder %s957_s16, %s957_s16 }
 0x112   :  { %v690_v48 = vsel %vm689_vm0, %v676_v47, %v688_v46 }
 0x113   :  { %v692_v49 = vadd.f32 %v690_v48, %v27_v45  ;;  %p964_p3 = por %p963_p2, %p962_p1 }
 0x115   :  { %694 = vst.msk [vmem:[#allocation2] sm:$0xff] %vm25_vm1, %v692_v49  ;;  %p965_p4 = pnand %p964_p3, %p958_p0 }
 0x11c   :  { %v698_v50 = vld [vmem:[#allocation2] sm:$0xff] }
 0x11d   :  { %v699_v51 = vmul.f32 0.0625, %v698_v50 }
 0x11f   :  { %930 = vmatmul.mubr.msk.f32.vlgmr.msra.gmra.mrb[0].mxu0 %vm25_vm1, %v699_v51 }
 0x1f2   :  { %v784_v54 = vpop.f32.mrb[0].mxu0 }
 0x1f3   :  { %v785_v53 = vadd.f32 %v896_v58, %v784_v54  ;;  %v931_v59 = vpop.f32.mrb[1].mxu0 }
 0x1f5   :  { %v788_v60 = vmax.f32 %v785_v53, 0.0 }
 0x1f7   :  { %935 = vmatmul.mubr.msk.f32.vlgmr.msra.gmra.mrb[0].mxu1 %vm797_vm3, %v788_v60 }
 0x2ca   :  { %v871_v62 = vpop.f32.mrb[0].mxu1 }
 0x2cb   :  { %v872_v35 = vadd.f32 %v898_v61, %v871_v62  ;;  %v936_v63 = vpop.f32.mrb[1].mxu1 }
 0x2cd   :  { %v901_v0 = vmul.f32 -1.442695, %v872_v35 }
 0x2cf   :  { %953 = vpow2.f32 %v901_v0 }
 0x2d9   :  { %v954_v2 = vpop.eup %953 }
 0x2da   :  { %v878_v1 = vadd.f32 1.0, %v954_v2 }
 0x2dc   :  { %955 = vrcp.f32 %v878_v1 }
 0x2e6   :  { %v956_v3 = vpop.eup %955 }
 0x2e7   :  { %881 = vst [vmem:[#allocation3] sm:$0xff] %v956_v3 }
 0x2e8   :  { %968 = shalt.err (!%p965_p4)
}
 0x2e9   :  { %s969_s18 = scalar_lea.hbm %s1510_s5, 128 }
 0x2ea   :  { %p970_p5 = scmp.ne.s32.totalorder %s1510_s5, %s969_s18  ;;  %p973_p6 = scmp.lt.u32.totalorder %s969_s18, %s1510_s5 }
 0x2ec   :  { %p975_p7 = pnand %p973_p6, %p970_p5 }
 0x2ee   :  { %978 = shalt.err (!%p975_p7)
}
 0x2ef   :  { %891 = dma.vmem_to_hbm [thread:$0]  %s889_s2, 128, %s1510_s5, [#allocation4]  }
 0x2f0   :  { %979 = dma.done.wait [#allocation4], 128  }
 0x2f1   :  { %980 = vsyncadd [#allocation4], 4294967168 }
 0x2f2   :  { %895 = vsyncpa [#allocation4], 1 }

</bundles_post_ra>
